<compile_context>
chip_gen: v5e
topology: v5e:2x2
jax: 0.10.0
libtpu: 0.0.40
codegen_flags: <defaults>
</compile_context>

<pallas_src>
import functools

import jax
import jax.numpy as jnp
from jax.experimental import pallas as pl
from jax.experimental.pallas import tpu as pltpu


def _round_up(x: int, m: int) -> int:
    return ((x + m - 1) // m) * m


def _bridge_kernel(x_ref, w1_ref, b1_ref, w2_ref, b2_ref, o_ref):
    """Fused multi-head MLP.

    x:  (B_p, in_dim_p)
    w1: (in_dim_p, H*hid_p)   head-concatenated first-layer weights (zero padded)
    b1: (1, H*hid_p)
    w2: (H, hid_p, out_p)     per-head second-layer weights (zero padded)
    b2: (H, 1, out_p)
    o:  (B_p, H*out_p)        lane-dense output (out_p is a multiple of 128)
    """
    H, hid_p, out_p = w2_ref.shape

    x = x_ref[...]
    # First layer for ALL heads as one MXU pass.
    h = jnp.dot(x, w1_ref[...], preferred_element_type=jnp.float32) + b1_ref[...]
    h = jax.nn.sigmoid(h)                     # EUP; dropout(eval) == identity
    h = h.astype(w2_ref.dtype)

    # Second layer: static unroll over heads; all slices are lane-aligned (multiples of 128).
    for i in range(H):
        hi = h[:, i * hid_p:(i + 1) * hid_p]                       # (B_p, hid_p)
        y = jnp.dot(hi, w2_ref[i], preferred_element_type=jnp.float32) + b2_ref[i]
        o_ref[:, i * out_p:(i + 1) * out_p] = y.astype(o_ref.dtype)


def pack_bridge_params(params, in_dim, out_dims, dtype=None):
    """Pack per-head params into 128-aligned, lane-dense fused arrays.

    Zero padding is numerically transparent:
      - extra W1 rows / x cols are zero -> no contribution to the contraction
      - extra hidden columns give sigmoid(0)=0.5, but their W2 rows are zero
      - extra output columns are zero and are sliced off after the kernel
    """
    hid = in_dim // 2
    H = len(out_dims)
    max_out = max(out_dims)
    in_dim_p = _round_up(in_dim, 128)
    hid_p = _round_up(hid, 128)
    out_p = _round_up(max_out, 128)
    if dtype is None:
        dtype = params[0][0].dtype

    w1_cat = jnp.zeros((in_dim_p, H * hid_p), dtype)
    b1_cat = jnp.zeros((1, H * hid_p), dtype)
    w2_stk = jnp.zeros((H, hid_p, out_p), dtype)
    b2_stk = jnp.zeros((H, 1, out_p), dtype)
    for h, ((w1, b1, w2, b2), d) in enumerate(zip(params, out_dims)):
        c0 = h * hid_p
        w1_cat = w1_cat.at[:in_dim, c0:c0 + hid].set(w1.astype(dtype))
        b1_cat = b1_cat.at[:, c0:c0 + hid].set(b1.astype(dtype))
        w2_stk = w2_stk.at[h, :hid, :d].set(w2.astype(dtype))
        b2_stk = b2_stk.at[h, :, :d].set(b2.astype(dtype))

    meta = dict(in_dim=in_dim, in_dim_p=in_dim_p, hid_p=hid_p, out_p=out_p)
    return (w1_cat, b1_cat, w2_stk, b2_stk), meta


@functools.partial(jax.jit, static_argnames=("meta_t", "out_dims_t"))
def _bridge_call(embed, w1, b1, w2, b2, *, meta_t, out_dims_t):
    meta = dict(meta_t)
    out_dims = list(out_dims_t)
    in_dim, in_dim_p = meta["in_dim"], meta["in_dim_p"]
    hid_p, out_p = meta["hid_p"], meta["out_p"]
    H = len(out_dims)

    B = embed.shape[0]
    B_p = _round_up(B, 8)

    # Pad batch (sublane) and input dim (lane) once in the wrapper.
    x = jnp.zeros((B_p, in_dim_p), embed.dtype).at[:B, :in_dim].set(embed)

    itemsize = jnp.dtype(embed.dtype).itemsize
    out_size = B_p * H * out_p
    bytes_accessed = itemsize * (x.size + w1.size + b1.size + w2.size + b2.size + out_size)
    flops = 2 * B_p * in_dim_p * (H * hid_p) + 2 * B_p * hid_p * out_p * H
    # Whole-array residency (no grid / no double-buffering); generous headroom.
    vmem_bytes = int(min((100 << 20), 2 * bytes_accessed + (4 << 20)))

    out = pl.pallas_call(
        _bridge_kernel,
        out_shape=jax.ShapeDtypeStruct((B_p, H * out_p), embed.dtype),
        in_specs=[pl.BlockSpec(memory_space=pltpu.MemorySpace.VMEM)] * 5,
        out_specs=pl.BlockSpec(memory_space=pltpu.MemorySpace.VMEM),
        compiler_params=pltpu.CompilerParams(vmem_limit_bytes=vmem_bytes),
        cost_estimate=pl.CostEstimate(
            flops=flops,
            transcendentals=B_p * H * hid_p,
            bytes_accessed=bytes_accessed),
    )(x, w1, b1, w2, b2)
    return out


def bridge_forward(embed, packed, meta, out_dims):
    """Fused multi-head forward. Returns a list of (batch, out_dims[i]) predictions,
    matching the PyTorch module's output list (heads sliced off the padded slab)."""
    w1, b1, w2, b2 = packed
    out_p = meta["out_p"]
    B = embed.shape[0]
    out = _bridge_call(embed, w1, b1, w2, b2,
                       meta_t=tuple(sorted(meta.items())),
                       out_dims_t=tuple(out_dims))
    # Per-head slicing of the padded slab (cheap for small H).
    return [out[:B, h * out_p: h * out_p + d] for h, d in enumerate(out_dims)]


def make_bridge_params(key, in_dim, out_dims, dtype=jnp.float32):
    """Deterministic per-head parameter init mirroring the module's shapes.

    Weights are stored (in_features, out_features) so the kernel computes
    y = x @ W + b directly (PyTorch nn.Linear stores (out, in))."""
    hid = in_dim // 2
    params = []
    for i, out_dim in enumerate(out_dims):
        k1, k2, k3, k4 = jax.random.split(jax.random.fold_in(key, i), 4)
        w1 = jax.random.normal(k1, (in_dim, hid), dtype) * (1.0 / jnp.sqrt(in_dim))
        b1 = jax.random.normal(k2, (1, hid), dtype) * 0.01
        w2 = jax.random.normal(k3, (hid, out_dim), dtype) * (1.0 / jnp.sqrt(hid))
        b2 = jax.random.normal(k4, (1, out_dim), dtype) * 0.01
        params.append((w1, b1, w2, b2))
    return params


def bridge_forward_ref(embed, params):
    """Pure-JAX reference for correctness checking (per-head, unfused)."""
    outs = []
    for (w1, b1, w2, b2) in params:
        h = jax.nn.sigmoid(embed @ w1 + b1)
        outs.append(h @ w2 + b2)
    return outs


if __name__ == "__main__":
    batch = 8
    in_dim = 32
    out_dims = [1, 1]
    # dropout_rate is irrelevant in eval mode (identity).

    key = jax.random.PRNGKey(0)
    k_embed, k_params = jax.random.split(key)
    embed = jax.random.normal(k_embed, (batch, in_dim), jnp.float32)
    params = make_bridge_params(k_params, in_dim, out_dims)
    packed, meta = pack_bridge_params(params, in_dim, out_dims)

    preds = bridge_forward(embed, packed, meta, out_dims)
    preds = [jax.block_until_ready(p) for p in preds]

    refs = bridge_forward_ref(embed, params)
    for p, r in zip(preds, refs):
        assert p.shape == r.shape, (p.shape, r.shape)
        assert jnp.allclose(p, r, atol=1e-5, rtol=1e-5), "mismatch vs reference"

    print("KERNEL_OK")
</pallas_src>

<mosaic_0001>
module attributes {stable_mosaic.version = 11 : i64} {
  func.func @_bridge_kernel(%arg0: memref<8x128xf32, #tpu.memory_space<vmem>>, %arg1: memref<128x256xf32, #tpu.memory_space<vmem>>, %arg2: memref<1x256xf32, #tpu.memory_space<vmem>>, %arg3: memref<2x128x128xf32, #tpu.memory_space<vmem>>, %arg4: memref<2x1x128xf32, #tpu.memory_space<vmem>>, %arg5: memref<8x256xf32, #tpu.memory_space<vmem>>) attributes {dimension_semantics = [], scalar_prefetch = 0 : i64, scratch_operands = 0 : i64, tpu.core_type = #tpu.core_type<tc>} {
    %c0 = arith.constant 0 : index
    %c0_0 = arith.constant 0 : index
    %0 = vector.load %arg0[%c0, %c0_0] : memref<8x128xf32, #tpu.memory_space<vmem>>, vector<8x128xf32>
    %c0_1 = arith.constant 0 : index
    %c0_2 = arith.constant 0 : index
    %1 = vector.load %arg1[%c0_1, %c0_2] : memref<128x256xf32, #tpu.memory_space<vmem>>, vector<128x256xf32>
    %cst = arith.constant dense<0.000000e+00> : vector<8x256xf32>
    %2 = tpu.matmul %0, %1, %cst {dimension_numbers = #tpu.dot_dimension_numbers<[1], [0], [0], [1], [0, 0, 1, 1], [], []>} : vector<8x128xf32>, vector<128x256xf32>, vector<8x256xf32> -> vector<8x256xf32>
    %c0_3 = arith.constant 0 : index
    %c0_4 = arith.constant 0 : index
    %3 = vector.load %arg2[%c0_3, %c0_4] : memref<1x256xf32, #tpu.memory_space<vmem>>, vector<1x256xf32>
    %4 = vector.broadcast %3 : vector<1x256xf32> to vector<8x256xf32>
    %5 = arith.addf %2, %4 : vector<8x256xf32>
    %6 = arith.negf %5 : vector<8x256xf32>
    %7 = math.exp %6 : vector<8x256xf32>
    %cst_5 = arith.constant 1.000000e+00 : f32
    %8 = vector.broadcast %cst_5 : f32 to vector<8x256xf32>
    %9 = arith.addf %8, %7 : vector<8x256xf32>
    %10 = arith.divf %8, %9 : vector<8x256xf32>
    %11 = vector.extract_strided_slice %10 {offsets = [0, 0], sizes = [8, 128], strides = [1, 1]} : vector<8x256xf32> to vector<8x128xf32>
    %c0_6 = arith.constant 0 : index
    %c0_7 = arith.constant 0 : index
    %c0_8 = arith.constant 0 : index
    %12 = vector.load %arg3[%c0_6, %c0_7, %c0_8] : memref<2x128x128xf32, #tpu.memory_space<vmem>>, vector<1x128x128xf32>
    %13 = vector.shape_cast %12 : vector<1x128x128xf32> to vector<128x128xf32>
    %cst_9 = arith.constant dense<0.000000e+00> : vector<8x128xf32>
    %14 = tpu.matmul %11, %13, %cst_9 {dimension_numbers = #tpu.dot_dimension_numbers<[1], [0], [0], [1], [0, 0, 1, 1], [], []>} : vector<8x128xf32>, vector<128x128xf32>, vector<8x128xf32> -> vector<8x128xf32>
    %c0_10 = arith.constant 0 : index
    %c0_11 = arith.constant 0 : index
    %c0_12 = arith.constant 0 : index
    %15 = vector.load %arg4[%c0_10, %c0_11, %c0_12] : memref<2x1x128xf32, #tpu.memory_space<vmem>>, vector<1x1x128xf32>
    %16 = vector.shape_cast %15 : vector<1x1x128xf32> to vector<1x128xf32>
    %17 = vector.broadcast %16 : vector<1x128xf32> to vector<8x128xf32>
    %18 = arith.addf %14, %17 : vector<8x128xf32>
    %c0_13 = arith.constant 0 : index
    %c0_14 = arith.constant 0 : index
    %19 = vector.load %arg5[%c0_13, %c0_14] : memref<8x256xf32, #tpu.memory_space<vmem>>, vector<8x128xf32>
    tpu.vector_store %arg5[%c0_13, %c0_14], %18 {strides = array<i32>} : memref<8x256xf32, #tpu.memory_space<vmem>>, vector<8x128xf32>,
    %20 = vector.extract_strided_slice %10 {offsets = [0, 128], sizes = [8, 128], strides = [1, 1]} : vector<8x256xf32> to vector<8x128xf32>
    %c1 = arith.constant 1 : index
    %c0_15 = arith.constant 0 : index
    %c0_16 = arith.constant 0 : index
    %21 = vector.load %arg3[%c1, %c0_15, %c0_16] : memref<2x128x128xf32, #tpu.memory_space<vmem>>, vector<1x128x128xf32>
    %22 = vector.shape_cast %21 : vector<1x128x128xf32> to vector<128x128xf32>
    %cst_17 = arith.constant dense<0.000000e+00> : vector<8x128xf32>
    %23 = tpu.matmul %20, %22, %cst_17 {dimension_numbers = #tpu.dot_dimension_numbers<[1], [0], [0], [1], [0, 0, 1, 1], [], []>} : vector<8x128xf32>, vector<128x128xf32>, vector<8x128xf32> -> vector<8x128xf32>
    %c1_18 = arith.constant 1 : index
    %c0_19 = arith.constant 0 : index
    %c0_20 = arith.constant 0 : index
    %24 = vector.load %arg4[%c1_18, %c0_19, %c0_20] : memref<2x1x128xf32, #tpu.memory_space<vmem>>, vector<1x1x128xf32>
    %25 = vector.shape_cast %24 : vector<1x1x128xf32> to vector<1x128xf32>
    %26 = vector.broadcast %25 : vector<1x128xf32> to vector<8x128xf32>
    %27 = arith.addf %23, %26 : vector<8x128xf32>
    %c0_21 = arith.constant 0 : index
    %c128 = arith.constant 128 : index
    %28 = vector.load %arg5[%c0_21, %c128] : memref<8x256xf32, #tpu.memory_space<vmem>>, vector<8x128xf32>
    tpu.vector_store %arg5[%c0_21, %c128], %27 {strides = array<i32>} : memref<8x256xf32, #tpu.memory_space<vmem>>, vector<8x128xf32>,
    return
  }
}

</mosaic_0001>

<bundles_post_ra>
// kernel: _bridge_call.1
= control target key start
LH: loop header
LB: loop body
LE: loop exit
PB: predicated region body
PF: predicated region fallthrough
CT: control target
= control target key end

     0   :  { %10 = vsyncpa [#allocation3], 0  ;;  %s428_s0 = inlined_call_operand.vmem [shape: f32[8,128], index: 0, kind: input, shape index: {}]   ;;  %s429_s1 = inlined_call_operand.hbm [shape: f32[128,256], index: 1, kind: input, shape index: {}]   ;;  %s430_s2 = inlined_call_operand.vmem [shape: f32[1,256], index: 2, kind: input, shape index: {}]   ;;  %s431_s3 = inlined_call_operand.hbm [shape: f32[2,128,128], index: 3, kind: input, shape index: {}]   ;;  %s432_s4 = inlined_call_operand.vmem [shape: f32[2,1,128], index: 4, kind: input, shape index: {}]   ;;  %s433_s5 = inlined_call_operand.hbm [shape: f32[8,256], index: 5, kind: output, shape index: {}]  }
   0x1   :  { %11 = vsyncpa [#allocation6], 0 }
   0x2   :  { %12 = vsyncpa [#allocation4], 0  ;;  %s19_s20 = sshll.u32 %s429_s1, 4  ;;  %s370_s21 = smov [#allocation2]   ;;  %s20_s20 = int_to_ptr.hbm [resolvable:$true] %s19_s20 }
   0x3   :  { %s21_s22 = sshll.u32 %s370_s21, 4  ;;  %s34_s25 = sshll.u32 %s431_s3, 4  ;;  %s22_s22 = int_to_ptr.vmem [resolvable:$true] %s21_s22  ;;  %s35_s25 = int_to_ptr.hbm [resolvable:$true] %s34_s25 }
   0x4   :  { %s371_s26 = smov 256   ;;  %s372_s27 = smov 16  }
   0x5   :  { %27 = dma.hbm_to_vmem [thread:$0]  %s20_s20, 4096, %s22_s22, [#allocation3], %s371_s26, %s371_s26, %s372_s27  }
   0x6   :  { %s373_s28 = smov [#allocation5]   ;;  %s374_s30 = smov 128  }
   0x7   :  { %s36_s29 = sshll.u32 %s373_s28, 4  ;;  %s375_s6 = smov 8   ;;  %s37_s29 = int_to_ptr.vmem [resolvable:$true] %s36_s29 }
   0x8   :  { %42 = dma.hbm_to_vmem [thread:$0]  %s35_s25, 4096, %s37_s29, [#allocation6], %s374_s30, %s374_s30, %s375_s6  }
   0x9   :  { %364 = dma.done.wait [#allocation3], 4096  }
   0xa   :  { %365 = vsyncadd [#allocation3], 4294963200 }
   0xb   :  { %366 = dma.done.wait [#allocation6], 4096  }
   0xc   :  { %367 = vsyncadd [#allocation6], 4294963200  ;;  %v84_v0 = vld [vmem:[#allocation2 + $0xf0] sm:$0xff]  ;;  %v85_v1 = vld [vmem:[#allocation2 + $0xf8] sm:$0xff]  ;;  %s376_s11 = smov [#allocation7]   ;;  %s261_s15 = sshll.u32 %s433_s5, 4  ;;  %s262_s15 = int_to_ptr.hbm [resolvable:$true] %s261_s15 }
   0xd   :  { %v82_v2 = vld [vmem:[#allocation2 + $0xe0] sm:$0xff]  ;;  %92 = vmatpush.msra.mxu0 %v84_v0  ;;  %112 = vmatpush.msra.mxu1 %v85_v1  ;;  %v83_v3 = vld [vmem:[#allocation2 + $0xe8] sm:$0xff]  ;;  %v80_v4 = vld [vmem:[#allocation2 + $0xd0] sm:$0xff]  ;;  %s259_s12 = sshll.u32 %s376_s11, 4  ;;  %s260_s12 = int_to_ptr.vmem [resolvable:$true] %s259_s12 }
   0xe   :  { %v81_v5 = vld [vmem:[#allocation2 + $0xd8] sm:$0xff]  ;;  %v78_v6 = vld [vmem:[#allocation2 + $0xc0] sm:$0xff]  ;;  %v79_v7 = vld [vmem:[#allocation2 + $0xc8] sm:$0xff] }
   0xf   :  { %93 = vmatpush.msra.mxu0 %v82_v2  ;;  %113 = vmatpush.msra.mxu1 %v83_v3  ;;  %v76_v8 = vld [vmem:[#allocation2 + $0xb0] sm:$0xff]  ;;  %v77_v9 = vld [vmem:[#allocation2 + $0xb8] sm:$0xff]  ;;  %v74_v10 = vld [vmem:[#allocation2 + $0xa0] sm:$0xff] }
  0x10   :  { %v75_v11 = vld [vmem:[#allocation2 + $0xa8] sm:$0xff]  ;;  %v72_v12 = vld [vmem:[#allocation2 + $0x90] sm:$0xff]  ;;  %v73_v13 = vld [vmem:[#allocation2 + $0x98] sm:$0xff] }
  0x11   :  { %94 = vmatpush.msra.mxu0 %v80_v4  ;;  %114 = vmatpush.msra.mxu1 %v81_v5  ;;  %v70_v14 = vld [vmem:[#allocation2 + $0x80] sm:$0xff]  ;;  %v71_v15 = vld [vmem:[#allocation2 + $0x88] sm:$0xff]  ;;  %v68_v16 = vld [vmem:[#allocation2 + $0x70] sm:$0xff] }
  0x12   :  { %v69_v17 = vld [vmem:[#allocation2 + $0x78] sm:$0xff]  ;;  %v66_v18 = vld [vmem:[#allocation2 + $0x60] sm:$0xff]  ;;  %v67_v19 = vld [vmem:[#allocation2 + $0x68] sm:$0xff] }
  0x13   :  { %95 = vmatpush.msra.mxu0 %v78_v6  ;;  %115 = vmatpush.msra.mxu1 %v79_v7  ;;  %v64_v20 = vld [vmem:[#allocation2 + $0x50] sm:$0xff]  ;;  %v65_v21 = vld [vmem:[#allocation2 + $0x58] sm:$0xff]  ;;  %v62_v22 = vld [vmem:[#allocation2 + $0x40] sm:$0xff] }
  0x14   :  { %v63_v23 = vld [vmem:[#allocation2 + $0x48] sm:$0xff]  ;;  %v60_v24 = vld [vmem:[#allocation2 + $0x30] sm:$0xff]  ;;  %v61_v25 = vld [vmem:[#allocation2 + $0x38] sm:$0xff] }
  0x15   :  { %96 = vmatpush.msra.mxu0 %v76_v8  ;;  %116 = vmatpush.msra.mxu1 %v77_v9  ;;  %v58_v26 = vld [vmem:[#allocation2 + $0x20] sm:$0xff]  ;;  %v59_v27 = vld [vmem:[#allocation2 + $0x28] sm:$0xff]  ;;  %v56_v28 = vld [vmem:[#allocation2 + $0x10] sm:$0xff] }
  0x16   :  { %v57_v29 = vld [vmem:[#allocation2 + $0x18] sm:$0xff]  ;;  %v54_v30 = vld [vmem:[#allocation2] sm:$0xff]  ;;  %v55_v31 = vld [vmem:[#allocation2 + $0x8] sm:$0xff] }
  0x17   :  { %97 = vmatpush.msra.mxu0 %v74_v10  ;;  %117 = vmatpush.msra.mxu1 %v75_v11  ;;  %v53_v32 = vld [vmem:[%s428_s0] sm:$0xff]  ;;  %v185_v33 = vld [vmem:[#allocation5 + $0x78] sm:$0xff]  ;;  %v184_v35 = vld [vmem:[#allocation5 + $0x70] sm:$0xff] }
  0x18   :  { %v227_v34 = vld [vmem:[#allocation5 + $0xf8] sm:$0xff]  ;;  %190 = vmatpush.msra.mxu2 %v185_v33  ;;  %v226_v36 = vld [vmem:[#allocation5 + $0xf0] sm:$0xff]  ;;  %v183_v37 = vld [vmem:[#allocation5 + $0x68] sm:$0xff] }
  0x19   :  { %98 = vmatpush.msra.mxu0 %v72_v12  ;;  %118 = vmatpush.msra.mxu1 %v73_v13  ;;  %v225_v38 = vld [vmem:[#allocation5 + $0xe8] sm:$0xff]  ;;  %v182_v39 = vld [vmem:[#allocation5 + $0x60] sm:$0xff]  ;;  %v181_v41 = vld [vmem:[#allocation5 + $0x58] sm:$0xff] }
  0x1a   :  { %233 = vmatpush.msra.mxu3 %v227_v34  ;;  %191 = vmatpush.msra.mxu2 %v184_v35  ;;  %v224_v40 = vld [vmem:[#allocation5 + $0xe0] sm:$0xff]  ;;  %v223_v42 = vld [vmem:[#allocation5 + $0xd8] sm:$0xff]  ;;  %v180_v43 = vld [vmem:[#allocation5 + $0x50] sm:$0xff] }
  0x1b   :  { %99 = vmatpush.msra.mxu0 %v70_v14  ;;  %119 = vmatpush.msra.mxu1 %v71_v15  ;;  %v222_v44 = vld [vmem:[#allocation5 + $0xd0] sm:$0xff]  ;;  %v179_v45 = vld [vmem:[#allocation5 + $0x48] sm:$0xff]  ;;  %v178_v47 = vld [vmem:[#allocation5 + $0x40] sm:$0xff] }
  0x1c   :  { %234 = vmatpush.msra.mxu3 %v226_v36  ;;  %192 = vmatpush.msra.mxu2 %v183_v37  ;;  %v221_v46 = vld [vmem:[#allocation5 + $0xc8] sm:$0xff]  ;;  %v220_v48 = vld [vmem:[#allocation5 + $0xc0] sm:$0xff]  ;;  %v177_v49 = vld [vmem:[#allocation5 + $0x38] sm:$0xff] }
  0x1d   :  { %100 = vmatpush.msra.mxu0 %v68_v16  ;;  %120 = vmatpush.msra.mxu1 %v69_v17  ;;  %v219_v50 = vld [vmem:[#allocation5 + $0xb8] sm:$0xff]  ;;  %v176_v51 = vld [vmem:[#allocation5 + $0x30] sm:$0xff]  ;;  %v175_v53 = vld [vmem:[#allocation5 + $0x28] sm:$0xff] }
  0x1e   :  { %235 = vmatpush.msra.mxu3 %v225_v38  ;;  %193 = vmatpush.msra.mxu2 %v182_v39  ;;  %v218_v52 = vld [vmem:[#allocation5 + $0xb0] sm:$0xff]  ;;  %v217_v54 = vld [vmem:[#allocation5 + $0xa8] sm:$0xff]  ;;  %v174_v55 = vld [vmem:[#allocation5 + $0x20] sm:$0xff] }
  0x1f   :  { %101 = vmatpush.msra.mxu0 %v66_v18  ;;  %121 = vmatpush.msra.mxu1 %v67_v19  ;;  %v216_v56 = vld [vmem:[#allocation5 + $0xa0] sm:$0xff]  ;;  %v173_v57 = vld [vmem:[#allocation5 + $0x18] sm:$0xff]  ;;  %v172_v59 = vld [vmem:[#allocation5 + $0x10] sm:$0xff] }
  0x20   :  { %236 = vmatpush.msra.mxu3 %v224_v40  ;;  %194 = vmatpush.msra.mxu2 %v181_v41  ;;  %v215_v58 = vld [vmem:[#allocation5 + $0x98] sm:$0xff]  ;;  %v214_v60 = vld [vmem:[#allocation5 + $0x90] sm:$0xff]  ;;  %v86_v61 = vld [vmem:[%s430_s2] sm:$0x3] }
  0x21   :  { %102 = vmatpush.msra.mxu0 %v64_v20  ;;  %122 = vmatpush.msra.mxu1 %v65_v21  ;;  %v171_v62 = vld [vmem:[#allocation5 + $0x8] sm:$0xff]  ;;  %v170_v0 = vld [vmem:[#allocation5] sm:$0xff]  ;;  %v88_v2 = vperm.slane %v86_v61, 0  ;;  %v89_v3 = vperm.slane %v86_v61, 1 }
  0x22   :  { %237 = vmatpush.msra.mxu3 %v223_v42  ;;  %195 = vmatpush.msra.mxu2 %v180_v43  ;;  %v213_v63 = vld [vmem:[#allocation5 + $0x88] sm:$0xff]  ;;  %v212_v1 = vld [vmem:[#allocation5 + $0x80] sm:$0xff] }
  0x23   :  { %103 = vmatpush.msra.mxu0 %v62_v22  ;;  %123 = vmatpush.msra.mxu1 %v63_v23  ;;  %v282_v34 = vld [vmem:[%s432_s4] ss:$0 sm:$0xff]  ;;  %v283_v35 = vld [vmem:[%s432_s4 + $0x1] ss:$0 sm:$0xff] }
  0x24   :  { %238 = vmatpush.msra.mxu3 %v222_v44  ;;  %196 = vmatpush.msra.mxu2 %v179_v45 }
  0x25   :  { %104 = vmatpush.msra.mxu0 %v60_v24  ;;  %124 = vmatpush.msra.mxu1 %v61_v25 }
  0x26   :  { %239 = vmatpush.msra.mxu3 %v221_v46  ;;  %197 = vmatpush.msra.mxu2 %v178_v47 }
  0x27   :  { %105 = vmatpush.msra.mxu0 %v58_v26  ;;  %125 = vmatpush.msra.mxu1 %v59_v27 }
  0x28   :  { %240 = vmatpush.msra.mxu3 %v220_v48  ;;  %198 = vmatpush.msra.mxu2 %v177_v49 }
  0x29   :  { %106 = vmatpush.msra.mxu0 %v56_v28  ;;  %126 = vmatpush.msra.mxu1 %v57_v29 }
  0x2a   :  { %241 = vmatpush.msra.mxu3 %v219_v50  ;;  %199 = vmatpush.msra.mxu2 %v176_v51 }
  0x2b   :  { %107 = vmatpush.msra.mxu0 %v54_v30  ;;  %127 = vmatpush.msra.mxu1 %v55_v31 }
  0x2c   :  { %108 = vmatmul.f32.vlgmr.msra.gmra.mxu0 %v53_v32  ;;  %128 = vmatmul.f32.vlgmr.msra.gmra.mxu1 %v53_v32 }
  0x2d   :  { %242 = vmatpush.msra.mxu3 %v218_v52  ;;  %200 = vmatpush.msra.mxu2 %v175_v53 }
  0x2f   :  { %243 = vmatpush.msra.mxu3 %v217_v54  ;;  %201 = vmatpush.msra.mxu2 %v174_v55 }
  0x31   :  { %244 = vmatpush.msra.mxu3 %v216_v56  ;;  %202 = vmatpush.msra.mxu2 %v173_v57 }
  0x33   :  { %245 = vmatpush.msra.mxu3 %v215_v58  ;;  %203 = vmatpush.msra.mxu2 %v172_v59 }
  0x35   :  { %246 = vmatpush.msra.mxu3 %v214_v60  ;;  %204 = vmatpush.msra.mxu2 %v171_v62 }
  0x37   :  { %247 = vmatpush.msra.mxu3 %v213_v63  ;;  %205 = vmatpush.msra.mxu2 %v170_v0 }
  0x39   :  { %248 = vmatpush.msra.mxu3 %v212_v1 }
  0xa9   :  { %v109_v4 = vpop.f32.mrf.mxu0  ;;  %v129_v5 = vpop.f32.mrf.mxu1 }
  0xaa   :  { %v110_v6 = vadd.f32 %v109_v4, %v88_v2  ;;  %v130_v7 = vadd.f32 %v129_v5, %v89_v3 }
  0xac   :  { %v272_v8 = vmul.f32 -1.442695, %v110_v6  ;;  %v273_v9 = vmul.f32 -1.442695, %v130_v7 }
  0xae   :  { %284 = vpow2.f32 %v272_v8 }
  0xaf   :  { %286 = vpow2.f32 %v273_v9 }
  0xb4   :  { %v285_v10 = vpop.eup %284 }
  0xb5   :  { %v287_v11 = vpop.eup %286  ;;  %v138_v12 = vadd.f32 1.0, %v285_v10 }
  0xb6   :  { %v139_v13 = vadd.f32 1.0, %v287_v11 }
  0xb7   :  { %288 = vrcp.f32 %v138_v12  ;;  %v151_v19 = vand.u32 2147483648, %v138_v12  ;;  %v149_v22 = vand.u32 2147483647, %v138_v12  ;;  %vm145_vm2 = vweird.f32 %v138_v12 }
  0xb8   :  { %290 = vrcp.f32 %v139_v13  ;;  %v166_v23 = vand.u32 2147483648, %v139_v13  ;;  %v164_v25 = vand.u32 2147483647, %v139_v13  ;;  %vm160_vm4 = vweird.f32 %v139_v13 }
  0xb9   :  { %v152_v27 = vor.u32 1.1754944e-38, %v151_v19  ;;  %vm150_vm5 = vcmp.eq.f32.partialorder %v149_v22, 8.507059e+37 }
  0xba   :  { %v167_v30 = vor.u32 1.1754944e-38, %v166_v23  ;;  %vm165_vm7 = vcmp.eq.f32.partialorder %v164_v25, 8.507059e+37 }
  0xbd   :  { %v289_v14 = vpop.eup %288 }
  0xbe   :  { %v291_v15 = vpop.eup %290  ;;  %v141_v16 = vmul.f32 %v289_v14, %v138_v12  ;;  %vm146_vm0 = vweird.f32 %v289_v14 }
  0xbf   :  { %v156_v17 = vmul.f32 %v291_v15, %v139_v13  ;;  %vm161_vm1 = vweird.f32 %v291_v15  ;;  %vm147_vm3 = vmor %vm145_vm2, %vm146_vm0 }
  0xc0   :  { %v142_v18 = vsub.f32 1.0, %v141_v16  ;;  %vm162_vm6 = vmor %vm160_vm4, %vm161_vm1 }
  0xc1   :  { %v157_v20 = vsub.f32 1.0, %v156_v17 }
  0xc2   :  { %v143_v21 = vmul.f32 %v289_v14, %v142_v18 }
  0xc3   :  { %v158_v24 = vmul.f32 %v291_v15, %v157_v20 }
  0xc4   :  { %v144_v26 = vadd.f32 %v289_v14, %v143_v21 }
  0xc5   :  { %v159_v28 = vadd.f32 %v291_v15, %v158_v24 }
  0xc6   :  { %v148_v29 = vsel %vm147_vm3, %v289_v14, %v144_v26 }
  0xc7   :  { %v153_v31 = vsel %vm150_vm5, %v152_v27, %v148_v29  ;;  %v163_v32 = vsel %vm162_vm6, %v291_v15, %v159_v28 }
  0xc8   :  { %206 = vmatmul.f32.vlgmr.msra.gmra.mxu2 %v153_v31  ;;  %v168_v33 = vsel %vm165_vm7, %v167_v30, %v163_v32 }
  0xc9   :  { %249 = vmatmul.f32.vlgmr.msra.gmra.mxu3 %v168_v33 }
 0x14b   :  { %v207_v36 = vpop.f32.mrf.mxu2 }
 0x14c   :  { %v208_v37 = vadd.f32 %v282_v34, %v207_v36  ;;  %v250_v38 = vpop.f32.mrf.mxu3 }
 0x14d   :  { %v251_v39 = vadd.f32 %v283_v35, %v250_v38 }
 0x14e   :  { %210 = vst [vmem:[#allocation7] sm:$0xff] %v208_v37 }
 0x14f   :  { %253 = vst [vmem:[#allocation7 + $0x8] sm:$0xff] %v251_v39 }
 0x150   :  { %264 = dma.vmem_to_hbm [thread:$0]  %s260_s12, 256, %s262_s15, [#allocation4]  }
 0x151   :  { %368 = dma.done.wait [#allocation4], 256  }
 0x152   :  { %369 = vsyncadd [#allocation4], 4294967040 }
 0x153   :  { %269 = vsyncpa [#allocation3], 1 }
 0x154   :  { %270 = vsyncpa [#allocation6], 1 }
 0x155   :  { %271 = vsyncpa [#allocation4], 1 }

</bundles_post_ra>
